<compile_context>
chip_gen: v7x
topology: tpu7x:2x2x1
jax: 0.10.0
libtpu: 0.0.40
codegen_flags: <defaults>
</compile_context>

<pallas_src>
import functools

import jax
import jax.numpy as jnp
from jax.experimental import pallas as pl
from jax.experimental.pallas import tpu as pltpu

_LANE = 128
_SUBLANE = 8
_TARGET_BLOCK_BYTES = 2 * 1024 * 1024  # ~2 MiB per input block (safe on v5e/v6e/v7x)


def _layernorm_kernel(x_ref, g_ref, b_ref, o_ref, *, eps, inv_c):
    # x_ref: (NB, C, ST, 128)   g_ref / b_ref: (1, C, 1, 1)
    # NOTE: for bf16 inputs on v6e/v7x one could keep the elementwise path in
    # bf16 and only do the statistics in f32; inputs here are f32 so the
    # astype below is a no-op.
    x = x_ref[...].astype(jnp.float32)

    mean = jnp.sum(x, axis=1, keepdims=True) * inv_c        # (NB, 1, ST, 128)
    d = x - mean                                            # reused below
    var = jnp.sum(d * d, axis=1, keepdims=True) * inv_c
    std = jnp.sqrt(var)

    # Exact divide keeps 1e-5 agreement with the reference; swap for
    # pl.reciprocal(std + eps, approx=True) if ~1e-3 relative drift is OK.
    inv = 1.0 / (std + eps)

    g = g_ref[...].astype(jnp.float32)                      # (1, C, 1, 1)
    b = b_ref[...].astype(jnp.float32)
    o_ref[...] = (d * inv * g + b).astype(o_ref.dtype)


def _pick_spatial_tile(s_rows, c, itemsize):
    """Sublane-tile (count of 128-lane rows) giving ~_TARGET_BLOCK_BYTES per N."""
    bytes_per_row = c * _LANE * itemsize
    st = max(1, _TARGET_BLOCK_BYTES // bytes_per_row)
    if st >= s_rows:
        return s_rows                      # full extent: always a legal block dim
    return max(_SUBLANE, (st // _SUBLANE) * _SUBLANE)  # sublane-aligned


def _pick_batch_tile(n, block_bytes_per_n):
    """Fold several batch elements into one block when per-N bytes are small."""
    for cand in range(n, 0, -1):
        if n % cand == 0 and cand * block_bytes_per_n <= _TARGET_BLOCK_BYTES:
            return cand
    return 1


def layer_norm_pallas(x, g, b, eps=1e-5):
    """x: (N, C, H, W); g, b: (1, C, 1, 1). Returns (N, C, H, W)."""
    N, C, H, W = x.shape
    HW = H * W
    itemsize = jnp.dtype(x.dtype).itemsize

    # Lane-dense spatial layout: (N, C, S, 128); pad spatial so every block is
    # full (padded columns produce junk that is sliced away; the reduction is
    # over C only, so padding never contaminates real outputs).
    s_rows = pl.cdiv(HW, _LANE)
    st = _pick_spatial_tile(s_rows, C, itemsize)
    s_pad = pl.cdiv(s_rows, st) * st
    pad_amt = s_pad * _LANE - HW

    x3 = x.reshape(N, C, HW)
    if pad_amt:
        x3 = jnp.pad(x3, ((0, 0), (0, 0), (0, pad_amt)))
    x4 = x3.reshape(N, C, s_pad, _LANE)

    nb = _pick_batch_tile(N, C * st * _LANE * itemsize)

    g4 = g.reshape(1, C, 1, 1).astype(x.dtype)
    b4 = b.reshape(1, C, 1, 1).astype(x.dtype)

    grid = (N // nb, s_pad // st)
    kernel = functools.partial(_layernorm_kernel, eps=eps, inv_c=1.0 / C)

    out4 = pl.pallas_call(
        kernel,
        out_shape=jax.ShapeDtypeStruct((N, C, s_pad, _LANE), x.dtype),
        grid_spec=pltpu.PrefetchScalarGridSpec(
            num_scalar_prefetch=0,
            grid=grid,
            in_specs=[
                pl.BlockSpec((nb, C, st, _LANE), lambda n, s: (n, 0, s, 0)),
                pl.BlockSpec((1, C, 1, 1), lambda n, s: (0, 0, 0, 0)),
                pl.BlockSpec((1, C, 1, 1), lambda n, s: (0, 0, 0, 0)),
            ],
            out_specs=pl.BlockSpec((nb, C, st, _LANE), lambda n, s: (n, 0, s, 0)),
        ),
        compiler_params=pltpu.CompilerParams(
            dimension_semantics=("parallel", "parallel"),
            vmem_limit_bytes=32 * 1024 * 1024,
        ),
    )(x4, g4, b4)

    out3 = out4.reshape(N, C, s_pad * _LANE)
    if pad_amt:
        out3 = out3[:, :, :HW]
    return out3.reshape(N, C, H, W)


def layer_norm_ref(x, g, b, eps=1e-5):
    mean = jnp.mean(x, axis=1, keepdims=True)
    var = jnp.mean((x - mean) ** 2, axis=1, keepdims=True)
    std = jnp.sqrt(var)
    return (x - mean) / (std + eps) * g + b


if __name__ == "__main__":
    key = jax.random.PRNGKey(0)
    N, C, H, W = 2, 4, 16, 16

    x = jax.random.normal(key, (N, C, H, W), dtype=jnp.float32)
    # nn.Parameter(torch.ones(1, dim, 1, 1)) / torch.zeros(1, dim, 1, 1)
    g = jnp.ones((1, C, 1, 1), dtype=jnp.float32)
    b = jnp.zeros((1, C, 1, 1), dtype=jnp.float32)

    out = layer_norm_pallas(x, g, b, eps=1e-5)
    out = jax.block_until_ready(out)

    ref = layer_norm_ref(x, g, b, eps=1e-5)
    assert out.shape == (N, C, H, W)
    assert jnp.allclose(out, ref, atol=1e-5, rtol=1e-5), "mismatch vs reference"

    print("KERNEL_OK")
</pallas_src>

<mosaic_0001>
module attributes {stable_mosaic.version = 11 : i64} {
  func.func @_layernorm_kernel(%arg0: i32, %arg1: i32, %arg2: memref<2x4x2x128xf32, #tpu.memory_space<vmem>>, %arg3: memref<1x4x1x1xf32, #tpu.memory_space<vmem>>, %arg4: memref<1x4x1x1xf32, #tpu.memory_space<vmem>>, %arg5: memref<2x4x2x128xf32, #tpu.memory_space<vmem>>) attributes {dimension_semantics = [#tpu.dimension_semantics<parallel>, #tpu.dimension_semantics<parallel>], iteration_bounds = array<i64: 1, 1>, scalar_prefetch = 0 : i64, scratch_operands = 0 : i64, tpu.core_type = #tpu.core_type<tc>, window_params = [{transform_indices = @transform_0, window_bounds = array<i64: 2, 4, 2, 128>}, {pipeline_mode = #tpu.pipeline_mode<synchronous>, transform_indices = @transform_1, window_bounds = array<i64: 1, 4, 1, 1>}, {pipeline_mode = #tpu.pipeline_mode<synchronous>, transform_indices = @transform_2, window_bounds = array<i64: 1, 4, 1, 1>}, {transform_indices = @transform_3, window_bounds = array<i64: 2, 4, 2, 128>}]} {
    %c0 = arith.constant 0 : index
    %c0_0 = arith.constant 0 : index
    %c0_1 = arith.constant 0 : index
    %c0_2 = arith.constant 0 : index
    %0 = vector.load %arg2[%c0, %c0_0, %c0_1, %c0_2] : memref<2x4x2x128xf32, #tpu.memory_space<vmem>>, vector<2x4x2x128xf32>
    %cst = arith.constant dense<0.000000e+00> : vector<2x2x128xf32>
    %1 = vector.multi_reduction <add>, %0, %cst [1] : vector<2x4x2x128xf32> to vector<2x2x128xf32>
    %2 = vector.shape_cast %1 : vector<2x2x128xf32> to vector<2x1x2x128xf32>
    %cst_3 = arith.constant 2.500000e-01 : f32
    %3 = vector.broadcast %cst_3 : f32 to vector<2x1x2x128xf32>
    %4 = arith.mulf %2, %3 : vector<2x1x2x128xf32>
    %5 = vector.broadcast %4 : vector<2x1x2x128xf32> to vector<2x4x2x128xf32>
    %6 = arith.subf %0, %5 : vector<2x4x2x128xf32>
    %7 = arith.mulf %6, %6 : vector<2x4x2x128xf32>
    %cst_4 = arith.constant dense<0.000000e+00> : vector<2x2x128xf32>
    %8 = vector.multi_reduction <add>, %7, %cst_4 [1] : vector<2x4x2x128xf32> to vector<2x2x128xf32>
    %9 = vector.shape_cast %8 : vector<2x2x128xf32> to vector<2x1x2x128xf32>
    %cst_5 = arith.constant 2.500000e-01 : f32
    %10 = vector.broadcast %cst_5 : f32 to vector<2x1x2x128xf32>
    %11 = arith.mulf %9, %10 : vector<2x1x2x128xf32>
    %12 = math.sqrt %11 : vector<2x1x2x128xf32>
    %cst_6 = arith.constant 9.99999974E-6 : f32
    %13 = vector.broadcast %cst_6 : f32 to vector<2x1x2x128xf32>
    %14 = arith.addf %12, %13 : vector<2x1x2x128xf32>
    %cst_7 = arith.constant 1.000000e+00 : f32
    %15 = vector.broadcast %cst_7 : f32 to vector<2x1x2x128xf32>
    %16 = arith.divf %15, %14 : vector<2x1x2x128xf32>
    %c0_8 = arith.constant 0 : index
    %c0_9 = arith.constant 0 : index
    %c0_10 = arith.constant 0 : index
    %c0_11 = arith.constant 0 : index
    %17 = vector.load %arg3[%c0_8, %c0_9, %c0_10, %c0_11] : memref<1x4x1x1xf32, #tpu.memory_space<vmem>>, vector<1x4x1x1xf32>
    %c0_12 = arith.constant 0 : index
    %c0_13 = arith.constant 0 : index
    %c0_14 = arith.constant 0 : index
    %c0_15 = arith.constant 0 : index
    %18 = vector.load %arg4[%c0_12, %c0_13, %c0_14, %c0_15] : memref<1x4x1x1xf32, #tpu.memory_space<vmem>>, vector<1x4x1x1xf32>
    %19 = vector.broadcast %16 : vector<2x1x2x128xf32> to vector<2x4x2x128xf32>
    %20 = arith.mulf %6, %19 : vector<2x4x2x128xf32>
    %21 = vector.broadcast %17 : vector<1x4x1x1xf32> to vector<2x4x2x128xf32>
    %22 = arith.mulf %20, %21 : vector<2x4x2x128xf32>
    %23 = vector.broadcast %18 : vector<1x4x1x1xf32> to vector<2x4x2x128xf32>
    %24 = arith.addf %22, %23 : vector<2x4x2x128xf32>
    %c0_16 = arith.constant 0 : index
    %c0_17 = arith.constant 0 : index
    %c0_18 = arith.constant 0 : index
    %c0_19 = arith.constant 0 : index
    %25 = vector.load %arg5[%c0_16, %c0_17, %c0_18, %c0_19] : memref<2x4x2x128xf32, #tpu.memory_space<vmem>>, vector<2x4x2x128xf32>
    tpu.vector_store %arg5[%c0_16, %c0_17, %c0_18, %c0_19], %24 {strides = array<i32>} : memref<2x4x2x128xf32, #tpu.memory_space<vmem>>, vector<2x4x2x128xf32>,
    return
  }
  func.func @transform_0(%arg0: i32, %arg1: i32) -> (i32, i32, i32, i32) {
    %c0_i32 = arith.constant 0 : i32
    %c0_i32_0 = arith.constant 0 : i32
    %c0_i32_1 = arith.constant 0 : i32
    return %arg0, %c0_i32, %arg1, %c0_i32_0 : i32, i32, i32, i32
  }
  func.func @transform_1(%arg0: i32, %arg1: i32) -> (i32, i32, i32, i32) {
    %c0_i32 = arith.constant 0 : i32
    %c0_i32_0 = arith.constant 0 : i32
    %c0_i32_1 = arith.constant 0 : i32
    %c0_i32_2 = arith.constant 0 : i32
    %c0_i32_3 = arith.constant 0 : i32
    return %c0_i32, %c0_i32_0, %c0_i32_1, %c0_i32_2 : i32, i32, i32, i32
  }
  func.func @transform_2(%arg0: i32, %arg1: i32) -> (i32, i32, i32, i32) {
    %c0_i32 = arith.constant 0 : i32
    %c0_i32_0 = arith.constant 0 : i32
    %c0_i32_1 = arith.constant 0 : i32
    %c0_i32_2 = arith.constant 0 : i32
    %c0_i32_3 = arith.constant 0 : i32
    return %c0_i32, %c0_i32_0, %c0_i32_1, %c0_i32_2 : i32, i32, i32, i32
  }
  func.func @transform_3(%arg0: i32, %arg1: i32) -> (i32, i32, i32, i32) {
    %c0_i32 = arith.constant 0 : i32
    %c0_i32_0 = arith.constant 0 : i32
    %c0_i32_1 = arith.constant 0 : i32
    return %arg0, %c0_i32, %arg1, %c0_i32_0 : i32, i32, i32, i32
  }
}

</mosaic_0001>

<bundles_post_ra>
// kernel: tpu_custom_call.1
= control target key start
LH: loop header
LB: loop body
LE: loop exit
PB: predicated region body
PF: predicated region fallthrough
CT: control target
= control target key end

     0   :  { %8 = vsyncpa [#allocation3], 0  ;;  %s401_s0 = inlined_call_operand.hbm [shape: f32[2,4,2,128], index: 0, kind: input, shape index: {}]   ;;  %s402_s1 = inlined_call_operand.vmem [shape: f32[1,4,1,1], index: 1, kind: input, shape index: {}]   ;;  %s403_s2 = inlined_call_operand.vmem [shape: f32[1,4,1,1], index: 2, kind: input, shape index: {}]   ;;  %s404_s3 = inlined_call_operand.hbm [shape: f32[2,4,2,128], index: 3, kind: output, shape index: {}]  }
   0x1   :  { %9 = vsyncpa [#allocation4], 0  ;;  %s306_s12 = smov [#allocation2]   ;;  %s258_s16 = scalar_lea.hbm %s401_s0, 256 }
   0x2   :  { %s15_s13 = sshll.u32 %s306_s12, 4  ;;  %p259_p0 = scmp.ne.s32.totalorder %s401_s0, %s258_s16  ;;  %s16_s13 = int_to_ptr.vmem [resolvable:$true] %s15_s13 }
   0x3   :  { %p262_p1 = scmp.lt.u32.totalorder %s258_s16, %s401_s0 }
   0x5   :  { %p264_p2 = pnand %p262_p1, %p259_p0 }
   0x7   :  { %267 = shalt.err (!%p264_p2)
}
   0x8   :  { %s268_s21 = scalar_lea.vmem %s16_s13, 256  ;;  %p273_p4 = scmp.lt.s32.totalorder %s16_s13, %s16_s13 }
   0x9   :  { %p269_p3 = scmp.ne.s32.totalorder %s16_s13, %s268_s21  ;;  %p274_p5 = scmp.lt.s32.totalorder %s268_s21, %s268_s21 }
   0xb   :  { %p275_p6 = por %p274_p5, %p273_p4 }
   0xd   :  { %p276_p7 = pnand %p275_p6, %p269_p3 }
   0xf   :  { %279 = shalt.err (!%p276_p7)
}
  0x10   :  { %s307_s22 = smov 32   ;;  %s308_s23 = smov 2  }
  0x11   :  { %21 = dma.hbm_to_vmem [thread:$0]  %s401_s0, 256, %s16_s13, [#allocation3], %s307_s22, %s307_s22, %s308_s23  }
  0x12   :  { %302 = dma.done.wait [#allocation3], 256  }
  0x13   :  { %303 = vsyncadd [#allocation3], 4294967040  ;;  %v309_v0 = vmov 0   ;;  %v237_v1 = vld [vmem:[%s402_s1 + $0x2] ss:$0 sm:$0xff]  ;;  %vm37_vm0 = vcmask 1041408  }
  0x14   :  { %249 = vset.pattern.permute.xlu1 %v309_v0  ;;  %248 = vset.pattern.permute.xlu0 %v309_v0  ;;  %v235_v2 = vld [vmem:[%s402_s1] ss:$0 sm:$0xff]  ;;  %v238_v3 = vld [vmem:[%s402_s1 + $0x3] ss:$0 sm:$0xff]  ;;  %v236_v4 = vld [vmem:[%s402_s1 + $0x1] ss:$0 sm:$0xff] }
  0x15   :  { %151 = vperm.xlu1 %249, %v237_v1   ;;  %143 = vperm.xlu0 %248, %v235_v2   ;;  %v240_v5 = vld [vmem:[%s403_s2 + $0x1] ss:$0 sm:$0xff]  ;;  %v239_v6 = vld [vmem:[%s403_s2] ss:$0 sm:$0xff]  ;;  %v242_v7 = vld [vmem:[%s403_s2 + $0x3] ss:$0 sm:$0xff] }
  0x16   :  { %v241_v8 = vld [vmem:[%s403_s2 + $0x2] ss:$0 sm:$0xff]  ;;  %v29_v9 = vld [vmem:[#allocation2] sm:$0x3]  ;;  %v33_v11 = vld [vmem:[#allocation2 + $0x8] sm:$0x3] }
  0x17   :  { %v30_v10 = vld [vmem:[#allocation2 + $0x2] sm:$0x3]  ;;  %v34_v12 = vld [vmem:[#allocation2 + $0xa] sm:$0x3]  ;;  %v38_v13 = vsel %vm37_vm0, %v29_v9, 0.0  ;;  %v45_v16 = vsel %vm37_vm0, %v33_v11, 0.0 }
  0x18   :  { %v39_v14 = vsel %vm37_vm0, %v30_v10, 0.0  ;;  %v31_v15 = vld [vmem:[#allocation2 + $0x4] sm:$0x3]  ;;  %v46_v17 = vsel %vm37_vm0, %v34_v12, 0.0  ;;  %v35_v18 = vld [vmem:[#allocation2 + $0xc] sm:$0x3] }
  0x19   :  { %155 = vperm.xlu1 %249, %v238_v3   ;;  %147 = vperm.xlu0 %248, %v236_v4   ;;  %v40_v19 = vadd.f32 %v39_v14, %v38_v13  ;;  %v41_v20 = vsel %vm37_vm0, %v31_v15, 0.0  ;;  %v47_v21 = vadd.f32 %v46_v17, %v45_v16  ;;  %v32_v22 = vld [vmem:[#allocation2 + $0x6] sm:$0x3]  ;;  %v48_v23 = vsel %vm37_vm0, %v35_v18, 0.0  ;;  %v36_v24 = vld [vmem:[#allocation2 + $0xe] sm:$0x3] }
  0x1a   :  { %v43_v26 = vsel %vm37_vm0, %v32_v22, 0.0  ;;  %v50_v28 = vsel %vm37_vm0, %v36_v24, 0.0  ;;  %s310_s1 = smov [#allocation5]  }
  0x1b   :  { %v42_v25 = vadd.f32 %v41_v20, %v40_v19  ;;  %v49_v27 = vadd.f32 %v48_v23, %v47_v21  ;;  %s223_s2 = sshll.u32 %s310_s1, 4  ;;  %s224_s2 = int_to_ptr.vmem [resolvable:$true] %s223_s2 }
  0x1c   :  { %s280_s14 = scalar_lea.vmem %s224_s2, 256  ;;  %p285_p9 = scmp.lt.s32.totalorder %s224_s2, %s224_s2 }
  0x1d   :  { %191 = vperm.xlu1 %249, %v240_v5   ;;  %187 = vperm.xlu0 %248, %v239_v6   ;;  %v44_v29 = vadd.f32 %v43_v26, %v42_v25  ;;  %v51_v30 = vadd.f32 %v50_v28, %v49_v27  ;;  %p281_p8 = scmp.ne.s32.totalorder %s224_s2, %s280_s14  ;;  %p286_p10 = scmp.lt.s32.totalorder %s280_s14, %s280_s14 }
  0x1f   :  { %v52_v31 = vmul.f32 0.25, %v44_v29  ;;  %v53_v32 = vmul.f32 0.25, %v51_v30  ;;  %p287_p11 = por %p286_p10, %p285_p9 }
  0x21   :  { %199 = vperm.xlu1 %249, %v242_v7   ;;  %195 = vperm.xlu0 %248, %v241_v8   ;;  %v54_v33 = vsub.f32 %v29_v9, %v52_v31  ;;  %v55_v34 = vsub.f32 %v30_v10, %v52_v31  ;;  %v58_v35 = vsub.f32 %v33_v11, %v53_v32  ;;  %p288_p12 = pnand %p287_p11, %p281_p8 }
  0x22   :  { %v59_v36 = vsub.f32 %v34_v12, %v53_v32  ;;  %v56_v37 = vsub.f32 %v31_v15, %v52_v31  ;;  %v60_v40 = vsub.f32 %v35_v18, %v53_v32  ;;  %v57_v43 = vsub.f32 %v32_v22, %v52_v31 }
  0x23   :  { %v62_v38 = vmul.f32 %v54_v33, %v54_v33  ;;  %v63_v39 = vmul.f32 %v55_v34, %v55_v34  ;;  %v66_v41 = vmul.f32 %v58_v35, %v58_v35  ;;  %v61_v47 = vsub.f32 %v36_v24, %v53_v32 }
  0x24   :  { %v67_v42 = vmul.f32 %v59_v36, %v59_v36  ;;  %v64_v44 = vmul.f32 %v56_v37, %v56_v37  ;;  %v68_v48 = vmul.f32 %v60_v40, %v60_v40  ;;  %v65_v52 = vmul.f32 %v57_v43, %v57_v43 }
  0x25   :  { %v70_v45 = vsel %vm37_vm0, %v62_v38, 0.0  ;;  %v71_v46 = vsel %vm37_vm0, %v63_v39, 0.0  ;;  %v77_v49 = vsel %vm37_vm0, %v66_v41, 0.0  ;;  %v69_v55 = vmul.f32 %v61_v47, %v61_v47 }
  0x26   :  { %v78_v50 = vsel %vm37_vm0, %v67_v42, 0.0  ;;  %v72_v51 = vadd.f32 %v71_v46, %v70_v45  ;;  %v73_v53 = vsel %vm37_vm0, %v64_v44, 0.0  ;;  %v80_v56 = vsel %vm37_vm0, %v68_v48, 0.0 }
  0x27   :  { %v79_v54 = vadd.f32 %v78_v50, %v77_v49  ;;  %v75_v58 = vsel %vm37_vm0, %v65_v52, 0.0  ;;  %v82_v60 = vsel %vm37_vm0, %v69_v55, 0.0 }
  0x28   :  { %v74_v57 = vadd.f32 %v73_v53, %v72_v51 }
  0x29   :  { %v81_v59 = vadd.f32 %v80_v56, %v79_v54 }
  0x2a   :  { %v76_v61 = vadd.f32 %v75_v58, %v74_v57 }
  0x2b   :  { %v83_v62 = vadd.f32 %v82_v60, %v81_v59 }
  0x2c   :  { %v84_v63 = vmul.f32 0.25, %v76_v61 }
  0x2d   :  { %v85_v0 = vmul.f32 0.25, %v83_v62 }
  0x2e   :  { %250 = vrsqrt.f32 %v84_v63  ;;  %vm88_vm1 = vcmp.eq.f32.partialorder %v84_v63, inf  ;;  %v91_v5 = vand.u32 2147483648, %v84_v63  ;;  %vm90_vm3 = vcmp.eq.f32.partialorder %v84_v63, 0.0 }
  0x2f   :  { %252 = vrsqrt.f32 %v85_v0  ;;  %vm95_vm2 = vcmp.eq.f32.partialorder %v85_v0, inf  ;;  %v98_v7 = vand.u32 2147483648, %v85_v0  ;;  %vm97_vm4 = vcmp.eq.f32.partialorder %v85_v0, 0.0 }
  0x38   :  { %v251_v1 = vpop.eup %250 }
  0x39   :  { %v253_v2 = vpop.eup %252  ;;  %v87_v3 = vmul.f32 %v251_v1, %v84_v63 }
  0x3a   :  { %v94_v4 = vmul.f32 %v253_v2, %v85_v0 }
  0x3b   :  { %v89_v6 = vsel %vm88_vm1, %v84_v63, %v87_v3 }
  0x3c   :  { %v96_v8 = vsel %vm95_vm2, %v85_v0, %v94_v4  ;;  %v92_v9 = vsel %vm90_vm3, %v91_v5, %v89_v6 }
  0x3d   :  { %v99_v10 = vsel %vm97_vm4, %v98_v7, %v96_v8  ;;  %v100_v11 = vadd.f32 1e-05, %v92_v9 }
  0x3e   :  { %v101_v12 = vadd.f32 1e-05, %v99_v10 }
  0x3f   :  { %254 = vrcp.f32 %v100_v11 }
  0x40   :  { %256 = vrcp.f32 %v101_v12 }
  0x49   :  { %v255_v13 = vpop.eup %254 }
  0x4a   :  { %v257_v14 = vpop.eup %256  ;;  %v114_v17 = vmul.f32 %v255_v13, %v54_v33  ;;  %v115_v19 = vmul.f32 %v255_v13, %v55_v34  ;;  %v116_v23 = vmul.f32 %v255_v13, %v56_v37  ;;  %v117_v25 = vmul.f32 %v255_v13, %v57_v43 }
  0x4b   :  { %v118_v18 = vmul.f32 %v257_v14, %v58_v35  ;;  %v119_v20 = vmul.f32 %v257_v14, %v59_v36  ;;  %v120_v24 = vmul.f32 %v257_v14, %v60_v40  ;;  %v121_v26 = vmul.f32 %v257_v14, %v61_v47 }
  0x94   :  { %v152_v15 = vpop.permute.xlu1 %151  ;;  %v144_v16 = vpop.permute.xlu0 %143 }
  0x95   :  { %v158_v27 = vmul.f32 %v144_v16, %v114_v17  ;;  %v162_v28 = vmul.f32 %v144_v16, %v118_v18  ;;  %v160_v33 = vmul.f32 %v152_v15, %v116_v23  ;;  %v164_v34 = vmul.f32 %v152_v15, %v120_v24 }
  0x98   :  { %v156_v21 = vpop.permute.xlu1 %155  ;;  %v148_v22 = vpop.permute.xlu0 %147 }
  0x99   :  { %v159_v29 = vmul.f32 %v148_v22, %v115_v19  ;;  %v163_v30 = vmul.f32 %v148_v22, %v119_v20  ;;  %v161_v35 = vmul.f32 %v156_v21, %v117_v25  ;;  %v165_v36 = vmul.f32 %v156_v21, %v121_v26 }
  0x9c   :  { %v192_v31 = vpop.permute.xlu1 %191  ;;  %v188_v32 = vpop.permute.xlu0 %187 }
  0x9d   :  { %v203_v38 = vadd.f32 %v192_v31, %v159_v29  ;;  %v207_v39 = vadd.f32 %v192_v31, %v163_v30  ;;  %v202_v41 = vadd.f32 %v188_v32, %v158_v27  ;;  %v206_v42 = vadd.f32 %v188_v32, %v162_v28 }
  0x9f   :  { %211 = vst [vmem:[#allocation5 + $0x2] sm:$0x3] %v203_v38  ;;  %215 = vst [vmem:[#allocation5 + $0xa] sm:$0x3] %v207_v39 }
  0xa0   :  { %210 = vst [vmem:[#allocation5] sm:$0x3] %v202_v41  ;;  %214 = vst [vmem:[#allocation5 + $0x8] sm:$0x3] %v206_v42  ;;  %v200_v37 = vpop.permute.xlu1 %199  ;;  %v196_v40 = vpop.permute.xlu0 %195 }
  0xa1   :  { %v205_v43 = vadd.f32 %v200_v37, %v161_v35  ;;  %v209_v44 = vadd.f32 %v200_v37, %v165_v36  ;;  %v204_v45 = vadd.f32 %v196_v40, %v160_v33  ;;  %v208_v46 = vadd.f32 %v196_v40, %v164_v34 }
  0xa3   :  { %213 = vst [vmem:[#allocation5 + $0x6] sm:$0x3] %v205_v43  ;;  %217 = vst [vmem:[#allocation5 + $0xe] sm:$0x3] %v209_v44 }
  0xa4   :  { %212 = vst [vmem:[#allocation5 + $0x4] sm:$0x3] %v204_v45  ;;  %216 = vst [vmem:[#allocation5 + $0xc] sm:$0x3] %v208_v46 }
  0xa5   :  { %291 = shalt.err (!%p288_p12)
}
  0xa6   :  { %s292_s17 = scalar_lea.hbm %s404_s3, 256 }
  0xa7   :  { %p293_p13 = scmp.ne.s32.totalorder %s404_s3, %s292_s17  ;;  %p296_p0 = scmp.lt.u32.totalorder %s292_s17, %s404_s3 }
  0xa9   :  { %p298_p1 = pnand %p296_p0, %p293_p13 }
  0xab   :  { %301 = shalt.err (!%p298_p1)
}
  0xac   :  { %229 = dma.vmem_to_hbm [thread:$0]  %s224_s2, 256, %s404_s3, [#allocation4], %s307_s22, %s307_s22, %s308_s23  }
  0xad   :  { %304 = dma.done.wait [#allocation4], 256  }
  0xae   :  { %305 = vsyncadd [#allocation4], 4294967040 }
  0xaf   :  { %233 = vsyncpa [#allocation3], 1 }
  0xb0   :  { %234 = vsyncpa [#allocation4], 1 }

</bundles_post_ra>
